<compile_context>
chip_gen: v7x
topology: tpu7x:2x2x1
jax: 0.10.0
libtpu: 0.0.40
codegen_flags: <defaults>
</compile_context>

<pallas_src>
import functools

import jax
import jax.numpy as jnp
from jax.experimental import pallas as pl
from jax.experimental.pallas import tpu as pltpu


def _round_up(x: int, m: int) -> int:
    return ((x + m - 1) // m) * m


# ---------------------------------------------------------------------------
# Optional pipeline_mode support (pl.Buffered); probed once with a tiny compile.
# ---------------------------------------------------------------------------
def _probe_pipeline_mode() -> bool:
    if not hasattr(pl, "Buffered"):
        return False
    try:
        def _k(x_ref, w_ref, o_ref):
            o_ref[...] = x_ref[...] + w_ref[...]

        f = pl.pallas_call(
            _k,
            out_shape=jax.ShapeDtypeStruct((16, 128), jnp.float32),
            grid_spec=pltpu.PrefetchScalarGridSpec(
                num_scalar_prefetch=0,
                grid=(2,),
                in_specs=[
                    pl.BlockSpec((8, 128), lambda i: (i, 0),
                                 pipeline_mode=pl.Buffered(3)),
                    pl.BlockSpec((8, 128), lambda i: (0, 0),
                                 pipeline_mode=pl.Buffered(1)),
                ],
                out_specs=pl.BlockSpec((8, 128), lambda i: (i, 0)),
            ),
        )
        jax.block_until_ready(
            f(jnp.zeros((16, 128), jnp.float32), jnp.zeros((8, 128), jnp.float32)))
        return True
    except Exception:
        return False


def _spec(shape, index_map, buffers=None):
    """BlockSpec with an optional non-default buffer count (if supported)."""
    if buffers is not None and buffers != 2 and _HAS_PIPELINE_MODE:
        return pl.BlockSpec(shape, index_map, pipeline_mode=pl.Buffered(buffers))
    return pl.BlockSpec(shape, index_map)


# ---------------------------------------------------------------------------
# Kernel
# ---------------------------------------------------------------------------
def _linear_head_kernel(x_ref, w_ref, b_ref, o_ref, *, cast_dtype):
    # x_ref: (TM, D) token tile, w_ref: (D, C_pad) resident transposed weight,
    # b_ref: (1, C_pad) f32 bias, o_ref: (TM, C_pad) logits tile.
    x = x_ref[...]
    if cast_dtype is not None:
        # In-kernel cast (e.g. f32 -> bf16) keeps HBM traffic at the caller dtype
        # while feeding the MXU at its native bf16 rate; accumulation stays f32.
        x = x.astype(cast_dtype)
    acc = jnp.dot(x, w_ref[...], preferred_element_type=jnp.float32)
    o_ref[...] = (acc + b_ref[...]).astype(o_ref.dtype)


# ---------------------------------------------------------------------------
# One-time parameter layout (hoist out of the hot path).
# ---------------------------------------------------------------------------
def prepare_linear_head_params(weight, bias, *, use_bf16_matmul: bool = False):
    """weight: (C, D) torch.nn.Linear layout; bias: (C,).

    Returns (w_t, b2d): (D, C_pad) transposed / class-padded weight (optionally
    bf16 for the MXU feed) and (1, C_pad) f32 bias.  C_pad = round_up(C, 128)
    so output stores are lane-dense.
    """
    C, D = weight.shape
    C_pad = _round_up(max(C, 1), 128)
    mm_dtype = jnp.bfloat16 if use_bf16_matmul else weight.dtype
    w_t = weight.T.astype(mm_dtype)            # (D, C)
    b = bias.astype(jnp.float32)
    if C_pad != C:
        w_t = jnp.pad(w_t, ((0, 0), (0, C_pad - C)))
        b = jnp.pad(b, (0, C_pad - C))
    return w_t, b.reshape(1, C_pad)


# ---------------------------------------------------------------------------
# Main call (prepared-params path; recommended for repeated use).
# ---------------------------------------------------------------------------
@functools.partial(jax.jit, static_argnames=("num_classes", "block_m", "x_buffers"))
def linear_segmentation_head_apply(x, w_t, b2d, *, num_classes: int,
                                   block_m: int = 512, x_buffers: int = 3):
    """
    Args:
        x:        (B, N, D) patch tokens
        w_t:      (D, C_pad) prepared weight (see prepare_linear_head_params)
        b2d:      (1, C_pad) prepared f32 bias
        num_classes: C (unpadded class count)
        block_m:  row-tile size; kept a multiple of the sublane packing
        x_buffers: pipeline depth for the streaming x tile (if supported)
    Returns:
        logits: (B, N, num_classes) in x.dtype
    """
    B, N, D = x.shape
    Dw, C_pad = w_t.shape
    if Dw != D:
        raise ValueError(f"weight D ({Dw}) != x D ({D})")
    M = B * N
    out_dtype = x.dtype
    mm_dtype = w_t.dtype
    cast_dtype = mm_dtype if x.dtype != mm_dtype else None

    # Sublane packing: 16 rows/vreg for 16-bit x, 8 for 32-bit x.
    sublane = 16 if jnp.dtype(x.dtype).itemsize == 2 else 8
    TM = min(int(block_m), _round_up(M, sublane))
    TM = max(sublane, (TM // sublane) * sublane)
    grid = (pl.cdiv(M, TM),)          # ragged last block: OOB stores are masked

    x2d = x.reshape(M, D)

    x_spec = _spec((TM, D), lambda i: (i, 0), buffers=x_buffers)   # streamed
    w_spec = _spec((D, C_pad), lambda i: (0, 0), buffers=1)        # resident
    b_spec = _spec((1, C_pad), lambda i: (0, 0), buffers=1)        # resident
    o_spec = pl.BlockSpec((TM, C_pad), lambda i: (i, 0))

    x_bytes = jnp.dtype(x.dtype).itemsize
    w_bytes = jnp.dtype(mm_dtype).itemsize
    o_bytes = jnp.dtype(out_dtype).itemsize

    x_bufs = x_buffers if _HAS_PIPELINE_MODE else 2
    w_bufs = 1 if _HAS_PIPELINE_MODE else 2
    vmem_bytes = (x_bufs * TM * D * x_bytes
                  + w_bufs * D * C_pad * w_bytes
                  + w_bufs * 8 * C_pad * 4          # bias tile (sublane-padded)
                  + 2 * TM * C_pad * o_bytes)
    # >= the 32 MiB v6e/v7x scoped default (raises v5e's 16 MiB), <= v7x physical.
    vmem_limit = int(min(max(vmem_bytes * 1.25 + (2 << 20), 32 << 20), 64 << 20))

    cost = pl.CostEstimate(
        flops=2 * M * D * C_pad,
        transcendentals=0,
        bytes_accessed=(M * D * x_bytes            # x
                        + D * C_pad * w_bytes      # weight (read once)
                        + C_pad * 4                # bias
                        + M * C_pad * o_bytes),    # logits
    )

    out = pl.pallas_call(
        functools.partial(_linear_head_kernel, cast_dtype=cast_dtype),
        out_shape=jax.ShapeDtypeStruct((M, C_pad), out_dtype),
        grid_spec=pltpu.PrefetchScalarGridSpec(
            num_scalar_prefetch=0,
            grid=grid,
            in_specs=[x_spec, w_spec, b_spec],
            out_specs=o_spec,
        ),
        compiler_params=pltpu.CompilerParams(
            # Row tiles are independent -> shard across v7x's 2 TensorCores;
            # neutral on single-TC v5e/v6e.
            dimension_semantics=("parallel",),
            vmem_limit_bytes=vmem_limit,
        ),
        cost_estimate=cost,
    )(x2d, w_t, b2d)

    # TODO(synk): consumers that immediately upsample / argmax could take the
    # C_pad-padded logits directly and skip this slice copy.
    return out[:, :num_classes].reshape(B, N, num_classes)


# ---------------------------------------------------------------------------
# Convenience wrapper matching the PyTorch module signature.
# NOTE: re-lays-out the weight every call; for repeated use prefer
# prepare_linear_head_params(...) once + linear_segmentation_head_apply(...).
# ---------------------------------------------------------------------------
def linear_segmentation_head(x, weight, bias, *, block_m: int = 512,
                             use_bf16_matmul: bool = False, x_buffers: int = 3):
    w_t, b2d = prepare_linear_head_params(weight, bias,
                                          use_bf16_matmul=use_bf16_matmul)
    return linear_segmentation_head_apply(
        x, w_t, b2d, num_classes=int(weight.shape[0]),
        block_m=block_m, x_buffers=x_buffers)


_HAS_PIPELINE_MODE = _probe_pipeline_mode()


if __name__ == "__main__":
    # Small shapes consistent with the module: B=2 images, N=16 patch tokens,
    # embed_dim=32, num_classes=8.
    B, N, D, C = 2, 16, 32, 8

    key = jax.random.PRNGKey(0)
    kx, kw, kb, k2 = jax.random.split(key, 4)

    x = jax.random.normal(kx, (B, N, D), dtype=jnp.float32)
    weight = jax.random.normal(kw, (C, D), dtype=jnp.float32) * (1.0 / jnp.sqrt(D))
    bias = jax.random.normal(kb, (C,), dtype=jnp.float32) * 0.01

    # --- f32 path, tiny shape (single grid step), convenience wrapper ---
    logits = jax.block_until_ready(linear_segmentation_head(x, weight, bias))
    ref = jnp.einsum("bnd,cd->bnc", x, weight,
                     precision=jax.lax.Precision.HIGHEST) + bias
    assert logits.shape == (B, N, C), logits.shape
    assert jnp.allclose(logits, ref, atol=1e-5, rtol=1e-5), "f32 mismatch vs reference"

    # --- f32 path, larger + ragged shape exercising cdiv tiling (no M padding),
    #     C padding slice, and the prepared-params fast path ---
    B2, N2, D2, C2 = 2, 1369, 256, 150          # M = 2738, not a multiple of TM=512
    kx2, kw2, kb2 = jax.random.split(k2, 3)
    x2 = jax.random.normal(kx2, (B2, N2, D2), dtype=jnp.float32)
    w2 = jax.random.normal(kw2, (C2, D2), dtype=jnp.float32) * (1.0 / jnp.sqrt(D2))
    b2 = jax.random.normal(kb2, (C2,), dtype=jnp.float32) * 0.01
    w2_t, b2_2d = prepare_linear_head_params(w2, b2)          # hoisted, done once
    logits2 = jax.block_until_ready(
        linear_segmentation_head_apply(x2, w2_t, b2_2d, num_classes=C2, block_m=512))
    ref2 = jnp.einsum("bnd,cd->bnc", x2, w2,
                      precision=jax.lax.Precision.HIGHEST) + b2
    assert logits2.shape == (B2, N2, C2), logits2.shape
    assert jnp.allclose(logits2, ref2, atol=2e-3, rtol=2e-3), "tiled mismatch vs reference"

    # --- bf16-fed MXU path (in-kernel cast, f32 accumulation), loose tolerance ---
    logits_bf16 = jax.block_until_ready(
        linear_segmentation_head(x, weight, bias, use_bf16_matmul=True))
    assert logits_bf16.shape == (B, N, C), logits_bf16.shape
    assert jnp.allclose(logits_bf16, ref, atol=0.1, rtol=0.1), "bf16 mismatch vs reference"

    print("KERNEL_OK")
</pallas_src>

<mosaic_0001>
module attributes {stable_mosaic.version = 11 : i64} {
  func.func @_linear_head_kernel(%arg0: i32, %arg1: memref<32x32xf32, #tpu.memory_space<vmem>>, %arg2: memref<32x128xf32, #tpu.memory_space<vmem>>, %arg3: memref<1x128xf32, #tpu.memory_space<vmem>>, %arg4: memref<32x128xf32, #tpu.memory_space<vmem>>) attributes {dimension_semantics = [#tpu.dimension_semantics<parallel>], iteration_bounds = array<i64: 1>, scalar_prefetch = 0 : i64, scratch_operands = 0 : i64, tpu.core_type = #tpu.core_type<tc>, window_params = [{transform_indices = @transform_0, window_bounds = array<i64: 32, 32>}, {pipeline_mode = #tpu.pipeline_mode<synchronous>, transform_indices = @transform_1, window_bounds = array<i64: 32, 128>}, {pipeline_mode = #tpu.pipeline_mode<synchronous>, transform_indices = @transform_2, window_bounds = array<i64: 1, 128>}, {transform_indices = @transform_3, window_bounds = array<i64: 32, 128>}]} {
    %c0 = arith.constant 0 : index
    %c0_0 = arith.constant 0 : index
    %0 = vector.load %arg1[%c0, %c0_0] : memref<32x32xf32, #tpu.memory_space<vmem>>, vector<32x32xf32>
    %c0_1 = arith.constant 0 : index
    %c0_2 = arith.constant 0 : index
    %1 = vector.load %arg2[%c0_1, %c0_2] : memref<32x128xf32, #tpu.memory_space<vmem>>, vector<32x128xf32>
    %cst = arith.constant dense<0.000000e+00> : vector<32x128xf32>
    %2 = tpu.matmul %0, %1, %cst {dimension_numbers = #tpu.dot_dimension_numbers<[1], [0], [0], [1], [0, 0, 1, 1], [], []>} : vector<32x32xf32>, vector<32x128xf32>, vector<32x128xf32> -> vector<32x128xf32>
    %c0_3 = arith.constant 0 : index
    %c0_4 = arith.constant 0 : index
    %3 = vector.load %arg3[%c0_3, %c0_4] : memref<1x128xf32, #tpu.memory_space<vmem>>, vector<1x128xf32>
    %4 = vector.broadcast %3 : vector<1x128xf32> to vector<32x128xf32>
    %5 = arith.addf %2, %4 : vector<32x128xf32>
    %c0_5 = arith.constant 0 : index
    %c0_6 = arith.constant 0 : index
    %6 = vector.load %arg4[%c0_5, %c0_6] : memref<32x128xf32, #tpu.memory_space<vmem>>, vector<32x128xf32>
    tpu.vector_store %arg4[%c0_5, %c0_6], %5 {strides = array<i32>} : memref<32x128xf32, #tpu.memory_space<vmem>>, vector<32x128xf32>,
    return
  }
  func.func @transform_0(%arg0: i32) -> (i32, i32) {
    %c0_i32 = arith.constant 0 : i32
    %c0_i32_0 = arith.constant 0 : i32
    return %arg0, %c0_i32 : i32, i32
  }
  func.func @transform_1(%arg0: i32) -> (i32, i32) {
    %c0_i32 = arith.constant 0 : i32
    %c0_i32_0 = arith.constant 0 : i32
    %c0_i32_1 = arith.constant 0 : i32
    return %c0_i32, %c0_i32_0 : i32, i32
  }
  func.func @transform_2(%arg0: i32) -> (i32, i32) {
    %c0_i32 = arith.constant 0 : i32
    %c0_i32_0 = arith.constant 0 : i32
    %c0_i32_1 = arith.constant 0 : i32
    return %c0_i32, %c0_i32_0 : i32, i32
  }
  func.func @transform_3(%arg0: i32) -> (i32, i32) {
    %c0_i32 = arith.constant 0 : i32
    %c0_i32_0 = arith.constant 0 : i32
    return %arg0, %c0_i32 : i32, i32
  }
}

</mosaic_0001>

<bundles_post_ra>
// kernel: linear_segmentation_head_apply.1
= control target key start
LH: loop header
LB: loop body
LE: loop exit
PB: predicated region body
PF: predicated region fallthrough
CT: control target
= control target key end

     0   :  { %8 = vsyncpa [#allocation3], 0  ;;  %s323_s0 = inlined_call_operand.hbm [shape: f32[32,32], index: 0, kind: input, shape index: {}]   ;;  %s324_s1 = inlined_call_operand.hbm [shape: f32[32,128], index: 1, kind: input, shape index: {}]   ;;  %s325_s2 = inlined_call_operand.vmem [shape: f32[1,128], index: 2, kind: input, shape index: {}]   ;;  %s326_s3 = inlined_call_operand.vmem [shape: f32[32,128], index: 3, kind: output, shape index: {}]  }
   0x1   :  { %9 = vsyncpa [#allocation5], 0  ;;  %s256_s12 = smov [#allocation2]   ;;  %s208_s16 = scalar_lea.hbm %s323_s0, 512 }
   0x2   :  { %s15_s13 = sshll.u32 %s256_s12, 4  ;;  %p209_p0 = scmp.ne.s32.totalorder %s323_s0, %s208_s16  ;;  %s16_s13 = int_to_ptr.vmem [resolvable:$true] %s15_s13 }
   0x3   :  { %p212_p1 = scmp.lt.u32.totalorder %s208_s16, %s323_s0 }
   0x5   :  { %p214_p2 = pnand %p212_p1, %p209_p0 }
   0x7   :  { %217 = shalt.err (!%p214_p2)
}
   0x8   :  { %s218_s21 = scalar_lea.vmem %s16_s13, 512  ;;  %p223_p4 = scmp.lt.s32.totalorder %s16_s13, %s16_s13 }
   0x9   :  { %p219_p3 = scmp.ne.s32.totalorder %s16_s13, %s218_s21  ;;  %p224_p5 = scmp.lt.s32.totalorder %s218_s21, %s218_s21 }
   0xb   :  { %p225_p6 = por %p224_p5, %p223_p4 }
   0xd   :  { %p226_p7 = pnand %p225_p6, %p219_p3 }
   0xf   :  { %229 = shalt.err (!%p226_p7)
}
  0x10   :  { %s257_s22 = smov 128   ;;  %s258_s23 = smov 8  }
  0x11   :  { %21 = dma.hbm_to_vmem [thread:$0]  %s323_s0, 512, %s16_s13, [#allocation3], %s257_s22, %s257_s22, %s258_s23  }
  0x12   :  { %s259_s26 = smov [#allocation4]   ;;  %s230_s30 = scalar_lea.hbm %s324_s1, 512 }
  0x13   :  { %s27_s27 = sshll.u32 %s259_s26, 4  ;;  %p231_p8 = scmp.ne.s32.totalorder %s324_s1, %s230_s30  ;;  %s28_s27 = int_to_ptr.vmem [resolvable:$true] %s27_s27 }
  0x14   :  { %p234_p9 = scmp.lt.u32.totalorder %s230_s30, %s324_s1 }
  0x16   :  { %p236_p10 = pnand %p234_p9, %p231_p8 }
  0x18   :  { %239 = shalt.err (!%p236_p10)
}
  0x19   :  { %s240_s8 = scalar_lea.vmem %s28_s27, 512  ;;  %p245_p12 = scmp.lt.s32.totalorder %s28_s27, %s28_s27 }
  0x1a   :  { %p241_p11 = scmp.ne.s32.totalorder %s28_s27, %s240_s8  ;;  %p246_p13 = scmp.lt.s32.totalorder %s240_s8, %s240_s8 }
  0x1c   :  { %p247_p0 = por %p246_p13, %p245_p12 }
  0x1e   :  { %p248_p1 = pnand %p247_p0, %p241_p11 }
  0x20   :  { %251 = shalt.err (!%p248_p1)
}
  0x21   :  { %33 = dma.hbm_to_vmem [thread:$0]  %s324_s1, 512, %s28_s27, [#allocation5], %s257_s22, %s257_s22, %s258_s23  }
  0x22   :  { %252 = dma.done.wait [#allocation3], 512  }
  0x23   :  { %253 = vsyncadd [#allocation3], 4294966784 }
  0x24   :  { %254 = dma.done.wait [#allocation5], 512  }
  0x25   :  { %255 = vsyncadd [#allocation5], 4294966784  ;;  %vm57_vm0 = vcmask 261120   ;;  %v46_v0 = vld [vmem:[#allocation4] sm:$0xff]  ;;  %v47_v1 = vld [vmem:[#allocation4 + $0x8] sm:$0xff] }
  0x26   :  { %v48_v2 = vld [vmem:[#allocation4 + $0x10] sm:$0xff]  ;;  %v192_v3 = vpack.c.bf16 %v47_v1, %v46_v0  ;;  %v49_v4 = vld [vmem:[#allocation4 + $0x18] sm:$0xff]  ;;  %v42_v5 = vld [vmem:[#allocation2] sm:$0xff] }
  0x27   :  { %v44_v6 = vld [vmem:[#allocation2 + $0x10] sm:$0xff]  ;;  %v196_v7 = vpack.c.bf16 %v49_v4, %v48_v2  ;;  %186 = vmatprep.mubr.msk.f32.mxu0 %vm57_vm0, %v42_v5  ;;  %v43_v8 = vld [vmem:[#allocation2 + $0x8] sm:$0xff]  ;;  %v45_v9 = vld [vmem:[#allocation2 + $0x18] sm:$0xff] }
  0x28   :  { %189 = vmatprep.mubr.msk.f32.mxu1 %vm57_vm0, %v44_v6  ;;  %193 = vmatprep.subr.bf16.mxu0 %v192_v3  ;;  %v165_v10 = vld [vmem:[%s325_s2] ss:$0 sm:$0xff] }
  0x29   :  { %200 = vmatprep.subr.bf16.mxu1 %v192_v3  ;;  %195 = vmatpush3.bf16.msra.mxu0 %v192_v3 }
  0x2a   :  { %202 = vmatpush3.bf16.msra.mxu1 %v192_v3  ;;  %197 = vmatprep.subr.bf16.mxu0 %v196_v7 }
  0x2b   :  { %201 = vmatprep.subr.bf16.mxu1 %v196_v7 }
  0x2d   :  { %199 = vmatpush3.bf16.msra.mxu0 %v196_v7 }
  0x2e   :  { %203 = vmatpush3.bf16.msra.mxu1 %v196_v7 }
  0x30   :  { %187 = vmatmul.mubr.msk.f32.vlgmr.msra.gmra.mrb[0].mxu0 %vm57_vm0, %v43_v8 }
  0x31   :  { %190 = vmatmul.mubr.msk.f32.vlgmr.msra.gmra.mrb[0].mxu1 %vm57_vm0, %v45_v9 }
 0x103   :  { %v188_v11 = vpop.f32.mrb[0].mxu0 }
 0x104   :  { %v191_v12 = vpop.f32.mrb[0].mxu1  ;;  %v142_v13 = vadd.f32 %v188_v11, %v165_v10  ;;  %v136_v15 = vpop.f32.mrb[1].mxu0 }
 0x105   :  { %v152_v14 = vadd.f32 %v191_v12, %v165_v10  ;;  %v146_v16 = vpop.f32.mrb[1].mxu1  ;;  %v137_v17 = vadd.f32 %v165_v10, %v136_v15 }
 0x106   :  { %v147_v18 = vadd.f32 %v165_v10, %v146_v16  ;;  %156 = vst [vmem:[%s326_s3 + $0x8] sm:$0xff] %v142_v13 }
 0x107   :  { %158 = vst [vmem:[%s326_s3 + $0x18] sm:$0xff] %v152_v14  ;;  %155 = vst [vmem:[%s326_s3] sm:$0xff] %v137_v17 }
 0x108   :  { %157 = vst [vmem:[%s326_s3 + $0x10] sm:$0xff] %v147_v18 }
 0x109   :  { %163 = vsyncpa [#allocation3], 1 }
 0x10a   :  { %164 = vsyncpa [#allocation5], 1 }

</bundles_post_ra>
